<compile_context>
chip_gen: v6e
topology: v6e:2x2x1
jax: 0.10.0
libtpu: 0.0.40
codegen_flags: <defaults>
</compile_context>

<pallas_src>
import jax
import jax.numpy as jnp
from jax import lax
from jax.experimental import pallas as pl
from jax.experimental.pallas import tpu as pltpu


def _round_up(v, m):
    return ((v + m - 1) // m) * m


def _lora_kernel(x_ref, w0t_ref, ax_ref, bt_ref, bias_ref, o_ref, acc_ref):
    """Grid = (M tiles, N tiles, K tiles); K (reduction) innermost.

    x_ref   : (tm, tk)          activations (compute dtype)
    w0t_ref : (tk, tn)          frozen base weight, pre-transposed
    ax_ref  : (tm, rank_pad)    precomputed x @ A^T (compute dtype)
    bt_ref  : (rank_pad, tn)    LoRA B, pre-transposed
    bias_ref: (1, tn)           fused (orig_bias + lora_b_bias), f32
    acc_ref : (tm, tn) f32 VMEM accumulator
    """
    k = pl.program_id(2)

    # Base path partial product for this K slab (NN dot -> straight MXU).
    partial = jnp.dot(x_ref[...], w0t_ref[...],
                      preferred_element_type=jnp.float32)

    @pl.when(k == 0)
    def _():
        acc_ref[...] = partial          # direct assign: no zero-init round-trip

    @pl.when(k > 0)
    def _():
        acc_ref[...] += partial

    @pl.when(k == pl.num_programs(2) - 1)
    def _():
        # Epilogue, once per (i, j) output tile: low-rank correction + bias.
        ba = jnp.dot(ax_ref[...], bt_ref[...],
                     preferred_element_type=jnp.float32)
        o_ref[...] = (acc_ref[...] + ba + bias_ref[...]).astype(o_ref.dtype)


def prepare_lora_weights(orig_weight, orig_bias, lora_a, lora_b, lora_b_bias, *,
                         compute_dtype=jnp.bfloat16, tile_n=1024, tile_k=1024):
    """One-time prep of the frozen/LoRA weights (cast + pad + transpose).

    orig_weight: (out_dim, in_dim); lora_a: (rank, in_dim);
    lora_b: (out_dim, rank); biases: (out_dim,).
    tile_n / tile_k must be multiples of 128.
    """
    out_dim, in_dim = orig_weight.shape
    rank = lora_a.shape[0]
    cd = compute_dtype

    in_pad = _round_up(in_dim, 128)
    out_pad = _round_up(out_dim, 128)
    rank_pad = _round_up(rank, 128)

    tn = min(tile_n, out_pad)
    tk = min(tile_k, in_pad)
    out_pad = _round_up(out_pad, tn)
    in_pad = _round_up(in_pad, tk)

    def pad2(arr, rows, cols, dt):
        arr = arr.astype(dt)
        pr, pc = rows - arr.shape[0], cols - arr.shape[1]
        if pr or pc:
            arr = jnp.pad(arr, ((0, pr), (0, pc)))
        return arr

    # Zero padding is exact: padded rows/cols contribute nothing to the dots.
    w0t = pad2(orig_weight, out_pad, in_pad, cd).T          # (in_pad, out_pad)
    at = pad2(lora_a, rank_pad, in_pad, cd).T               # (in_pad, rank_pad)
    bt = pad2(lora_b, out_pad, rank_pad, cd).T              # (rank_pad, out_pad)
    bias = (orig_bias + lora_b_bias).reshape(1, out_dim)
    bias = pad2(bias, 1, out_pad, jnp.float32)              # (1, out_pad), f32

    return dict(w0t=w0t, at=at, bt=bt, bias=bias,
                in_dim=in_dim, out_dim=out_dim, rank=rank,
                in_pad=in_pad, out_pad=out_pad, rank_pad=rank_pad,
                tn=tn, tk=tk, compute_dtype=cd)


def lora_apply(x, prep, *, tile_m=512):
    """Per-call path: pad x, precompute a_x, run the fused Pallas kernel."""
    M, in_dim = x.shape
    assert in_dim == prep["in_dim"]
    cd = prep["compute_dtype"]
    out_dtype = x.dtype
    in_pad, out_pad, rank_pad = prep["in_pad"], prep["out_pad"], prep["rank_pad"]
    tn, tk = prep["tn"], prep["tk"]
    out_dim, rank = prep["out_dim"], prep["rank"]

    tm = min(tile_m, _round_up(M, 8))
    m_pad = _round_up(M, tm)

    x_p = x.astype(cd)
    pr, pc = m_pad - M, in_pad - in_dim
    if pr or pc:
        x_p = jnp.pad(x_p, ((0, pr), (0, pc)))

    # Precompute a_x = x @ A^T once (tiny (M, rank) matmul; f32 accumulate,
    # then cast back to the compute dtype for the in-kernel B^T dot).
    ax = jnp.dot(x_p, prep["at"], preferred_element_type=jnp.float32,
                 precision=lax.Precision.HIGHEST).astype(cd)   # (m_pad, rank_pad)

    grid = (m_pad // tm, out_pad // tn, in_pad // tk)

    itemsize_cd = jnp.dtype(cd).itemsize
    out_itemsize = jnp.dtype(out_dtype).itemsize

    # VMEM budget derived from the actual tile footprint (double-buffered
    # inputs/outputs + f32 accumulator scratch) + headroom; stays well inside
    # v7x's 64 MiB/TC at the default tiles.
    footprint = (
        2 * tm * tk * itemsize_cd          # x
        + 2 * tk * tn * itemsize_cd        # W0^T
        + 2 * tm * rank_pad * itemsize_cd  # a_x
        + 2 * rank_pad * tn * itemsize_cd  # B^T
        + 2 * tn * 4                       # fused bias (f32)
        + 2 * tm * tn * out_itemsize       # output
        + tm * tn * 4                      # f32 accumulator scratch
    )
    vmem_limit = int(min(max(footprint * 3 // 2, 16 << 20), 96 << 20))

    flops = 2 * M * in_dim * out_dim + 2 * M * rank * out_dim
    bytes_accessed = int(
        grid[1] * m_pad * in_pad * itemsize_cd        # x streamed per N tile
        + grid[0] * in_pad * out_pad * itemsize_cd    # W0^T streamed per M tile
        + m_pad * rank_pad * itemsize_cd
        + grid[0] * rank_pad * out_pad * itemsize_cd
        + out_pad * 4
        + m_pad * out_pad * out_itemsize)

    out_padded = pl.pallas_call(
        _lora_kernel,
        out_shape=jax.ShapeDtypeStruct((m_pad, out_pad), out_dtype),
        grid_spec=pltpu.PrefetchScalarGridSpec(
            num_scalar_prefetch=0,
            grid=grid,
            in_specs=[
                pl.BlockSpec((tm, tk), lambda i, j, k: (i, k)),          # x
                pl.BlockSpec((tk, tn), lambda i, j, k: (k, j)),          # W0^T
                pl.BlockSpec((tm, rank_pad), lambda i, j, k: (i, 0)),    # a_x
                pl.BlockSpec((rank_pad, tn), lambda i, j, k: (0, j)),    # B^T
                pl.BlockSpec((1, tn), lambda i, j, k: (0, j)),           # fused bias
            ],
            out_specs=pl.BlockSpec((tm, tn), lambda i, j, k: (i, j)),
            scratch_shapes=[
                pltpu.VMEM((tm, tn), jnp.float32),   # f32 output accumulator
            ],
        ),
        compiler_params=pltpu.CompilerParams(
            dimension_semantics=("parallel", "parallel", "arbitrary"),
            vmem_limit_bytes=vmem_limit,
        ),
        cost_estimate=pl.CostEstimate(
            flops=flops, transcendentals=0, bytes_accessed=bytes_accessed),
    )(x_p, prep["w0t"], ax, prep["bt"], prep["bias"])

    return out_padded[:M, :out_dim]


def lora_forward(x, orig_weight, orig_bias, lora_a, lora_b, lora_b_bias, *,
                 compute_dtype=jnp.bfloat16,
                 tile_m=512, tile_n=1024, tile_k=1024):
    """Convenience wrapper (prep + apply). For production, call
    prepare_lora_weights once and reuse the result across calls so the frozen
    weights are not re-cast/re-padded through HBM on every forward."""
    prep = prepare_lora_weights(
        orig_weight, orig_bias, lora_a, lora_b, lora_b_bias,
        compute_dtype=compute_dtype, tile_n=tile_n, tile_k=tile_k)
    return lora_apply(x, prep, tile_m=tile_m)


if __name__ == "__main__":
    key = jax.random.PRNGKey(0)
    k_x, k_w, k_b, k_a, k_b2, k_bb = jax.random.split(key, 6)

    # Small shapes consistent with the module: tokens=8, in=32, out=32, rank=4.
    M, in_dim, out_dim, rank = 8, 32, 32, 4

    x = jax.random.normal(k_x, (M, in_dim), dtype=jnp.float32)
    orig_weight = jax.random.normal(k_w, (out_dim, in_dim), dtype=jnp.float32) * 0.1
    orig_bias = jax.random.normal(k_b, (out_dim,), dtype=jnp.float32) * 0.1
    # LoRA A ~ N(0, 0.01) as in the module; B / b_lora given small nonzero
    # values so the low-rank branch is actually exercised (module init B=0
    # would make that path trivially zero).
    lora_a = jax.random.normal(k_a, (rank, in_dim), dtype=jnp.float32) * 0.01
    lora_b = jax.random.normal(k_b2, (out_dim, rank), dtype=jnp.float32) * 0.01
    lora_b_bias = jax.random.normal(k_bb, (out_dim,), dtype=jnp.float32) * 0.01

    # Reference in plain JAX (same math as the PyTorch forward), f32.
    ref = x @ orig_weight.T + orig_bias
    ref = ref + (x @ lora_a.T) @ lora_b.T + lora_b_bias

    # 1) Full-precision kernel run: tight check.
    out_f32 = lora_forward(x, orig_weight, orig_bias, lora_a, lora_b, lora_b_bias,
                           compute_dtype=jnp.float32)
    out_f32 = jax.block_until_ready(out_f32)
    assert out_f32.shape == (M, out_dim)
    assert jnp.allclose(out_f32, ref, atol=1e-5, rtol=1e-5), \
        float(jnp.max(jnp.abs(out_f32 - ref)))

    # 2) Default (bf16-compute, f32-accumulate) run: loose check vs f32 reference.
    out_bf16 = lora_forward(x, orig_weight, orig_bias, lora_a, lora_b, lora_b_bias)
    out_bf16 = jax.block_until_ready(out_bf16)
    assert out_bf16.shape == (M, out_dim)
    assert jnp.allclose(out_bf16, ref, atol=5e-2, rtol=5e-2), \
        float(jnp.max(jnp.abs(out_bf16 - ref)))

    # 3) Reuse path: one-time weight prep + repeated apply (production pattern).
    prep = prepare_lora_weights(orig_weight, orig_bias, lora_a, lora_b, lora_b_bias)
    out_reuse = jax.block_until_ready(lora_apply(x, prep))
    assert jnp.allclose(out_reuse, ref, atol=5e-2, rtol=5e-2)

    # TODO(synk): optional v7x-only fp8(e4m3)+per-channel-scale path for the
    # frozen W0 stream (dequant in the epilogue) — not implemented here.
    print("KERNEL_OK")
</pallas_src>

<mosaic_0001>
module attributes {stable_mosaic.version = 11 : i64} {
  func.func @_lora_kernel(%arg0: i32, %arg1: i32, %arg2: i32, %arg3: memref<8x128xf32, #tpu.memory_space<vmem>>, %arg4: memref<128x128xf32, #tpu.memory_space<vmem>>, %arg5: memref<8x128xf32, #tpu.memory_space<vmem>>, %arg6: memref<128x128xf32, #tpu.memory_space<vmem>>, %arg7: memref<1x128xf32, #tpu.memory_space<vmem>>, %arg8: memref<8x128xf32, #tpu.memory_space<vmem>>, %arg9: memref<8x128xf32, #tpu.memory_space<vmem>>) attributes {dimension_semantics = [#tpu.dimension_semantics<parallel>, #tpu.dimension_semantics<parallel>, #tpu.dimension_semantics<arbitrary>], iteration_bounds = array<i64: 1, 1, 1>, scalar_prefetch = 0 : i64, scratch_operands = 1 : i64, tpu.core_type = #tpu.core_type<tc>, window_params = [{transform_indices = @transform_0, window_bounds = array<i64: 8, 128>}, {transform_indices = @transform_1, window_bounds = array<i64: 128, 128>}, {transform_indices = @transform_2, window_bounds = array<i64: 8, 128>}, {transform_indices = @transform_3, window_bounds = array<i64: 128, 128>}, {transform_indices = @transform_4, window_bounds = array<i64: 1, 128>}, {transform_indices = @transform_5, window_bounds = array<i64: 8, 128>}]} {
    %c0 = arith.constant 0 : index
    %c0_0 = arith.constant 0 : index
    %0 = vector.load %arg3[%c0, %c0_0] : memref<8x128xf32, #tpu.memory_space<vmem>>, vector<8x128xf32>
    %c0_1 = arith.constant 0 : index
    %c0_2 = arith.constant 0 : index
    %1 = vector.load %arg4[%c0_1, %c0_2] : memref<128x128xf32, #tpu.memory_space<vmem>>, vector<128x128xf32>
    %cst = arith.constant dense<0.000000e+00> : vector<8x128xf32>
    %2 = tpu.matmul %0, %1, %cst {dimension_numbers = #tpu.dot_dimension_numbers<[1], [0], [0], [1], [0, 0, 1, 1], [], []>} : vector<8x128xf32>, vector<128x128xf32>, vector<8x128xf32> -> vector<8x128xf32>
    %c0_i32 = arith.constant 0 : i32
    %3 = arith.cmpi eq, %arg2, %c0_i32 : i32
    %4 = arith.extui %3 : i1 to i32
    %c0_i32_3 = arith.constant 0 : i32
    %5 = arith.cmpi ne, %4, %c0_i32_3 : i32
    scf.if %5 {
      %c0_8 = arith.constant 0 : index
      %c0_9 = arith.constant 0 : index
      %12 = vector.load %arg9[%c0_8, %c0_9] : memref<8x128xf32, #tpu.memory_space<vmem>>, vector<8x128xf32>
      tpu.vector_store %arg9[%c0_8, %c0_9], %2 {strides = array<i32>} : memref<8x128xf32, #tpu.memory_space<vmem>>, vector<8x128xf32>,
    } else {
    }
    %c0_i32_4 = arith.constant 0 : i32
    %6 = arith.cmpi sgt, %arg2, %c0_i32_4 : i32
    %7 = arith.extui %6 : i1 to i32
    %c0_i32_5 = arith.constant 0 : i32
    %8 = arith.cmpi ne, %7, %c0_i32_5 : i32
    scf.if %8 {
      %c0_8 = arith.constant 0 : index
      %c0_9 = arith.constant 0 : index
      %12 = vector.load %arg9[%c0_8, %c0_9] : memref<8x128xf32, #tpu.memory_space<vmem>>, vector<8x128xf32>
      %13 = arith.addf %12, %2 : vector<8x128xf32>
      %c0_10 = arith.constant 0 : index
      %c0_11 = arith.constant 0 : index
      %14 = vector.load %arg9[%c0_10, %c0_11] : memref<8x128xf32, #tpu.memory_space<vmem>>, vector<8x128xf32>
      tpu.vector_store %arg9[%c0_10, %c0_11], %13 {strides = array<i32>} : memref<8x128xf32, #tpu.memory_space<vmem>>, vector<8x128xf32>,
    } else {
    }
    %c0_i32_6 = arith.constant 0 : i32
    %9 = arith.cmpi eq, %arg2, %c0_i32_6 : i32
    %10 = arith.extui %9 : i1 to i32
    %c0_i32_7 = arith.constant 0 : i32
    %11 = arith.cmpi ne, %10, %c0_i32_7 : i32
    scf.if %11 {
      %c0_8 = arith.constant 0 : index
      %c0_9 = arith.constant 0 : index
      %12 = vector.load %arg5[%c0_8, %c0_9] : memref<8x128xf32, #tpu.memory_space<vmem>>, vector<8x128xf32>
      %c0_10 = arith.constant 0 : index
      %c0_11 = arith.constant 0 : index
      %13 = vector.load %arg6[%c0_10, %c0_11] : memref<128x128xf32, #tpu.memory_space<vmem>>, vector<128x128xf32>
      %cst_12 = arith.constant dense<0.000000e+00> : vector<8x128xf32>
      %14 = tpu.matmul %12, %13, %cst_12 {dimension_numbers = #tpu.dot_dimension_numbers<[1], [0], [0], [1], [0, 0, 1, 1], [], []>} : vector<8x128xf32>, vector<128x128xf32>, vector<8x128xf32> -> vector<8x128xf32>
      %c0_13 = arith.constant 0 : index
      %c0_14 = arith.constant 0 : index
      %15 = vector.load %arg9[%c0_13, %c0_14] : memref<8x128xf32, #tpu.memory_space<vmem>>, vector<8x128xf32>
      %16 = arith.addf %15, %14 : vector<8x128xf32>
      %c0_15 = arith.constant 0 : index
      %c0_16 = arith.constant 0 : index
      %17 = vector.load %arg7[%c0_15, %c0_16] : memref<1x128xf32, #tpu.memory_space<vmem>>, vector<1x128xf32>
      %18 = vector.broadcast %17 : vector<1x128xf32> to vector<8x128xf32>
      %19 = arith.addf %16, %18 : vector<8x128xf32>
      %c0_17 = arith.constant 0 : index
      %c0_18 = arith.constant 0 : index
      %20 = vector.load %arg8[%c0_17, %c0_18] : memref<8x128xf32, #tpu.memory_space<vmem>>, vector<8x128xf32>
      tpu.vector_store %arg8[%c0_17, %c0_18], %19 {strides = array<i32>} : memref<8x128xf32, #tpu.memory_space<vmem>>, vector<8x128xf32>,
    } else {
    }
    return
  }
  func.func @transform_0(%arg0: i32, %arg1: i32, %arg2: i32) -> (i32, i32) {
    %c0_i32 = arith.constant 0 : i32
    return %arg0, %arg2 : i32, i32
  }
  func.func @transform_1(%arg0: i32, %arg1: i32, %arg2: i32) -> (i32, i32) {
    %c0_i32 = arith.constant 0 : i32
    return %arg2, %arg1 : i32, i32
  }
  func.func @transform_2(%arg0: i32, %arg1: i32, %arg2: i32) -> (i32, i32) {
    %c0_i32 = arith.constant 0 : i32
    %c0_i32_0 = arith.constant 0 : i32
    return %arg0, %c0_i32 : i32, i32
  }
  func.func @transform_3(%arg0: i32, %arg1: i32, %arg2: i32) -> (i32, i32) {
    %c0_i32 = arith.constant 0 : i32
    %c0_i32_0 = arith.constant 0 : i32
    return %c0_i32, %arg1 : i32, i32
  }
  func.func @transform_4(%arg0: i32, %arg1: i32, %arg2: i32) -> (i32, i32) {
    %c0_i32 = arith.constant 0 : i32
    %c0_i32_0 = arith.constant 0 : i32
    return %c0_i32, %arg1 : i32, i32
  }
  func.func @transform_5(%arg0: i32, %arg1: i32, %arg2: i32) -> (i32, i32) {
    %c0_i32 = arith.constant 0 : i32
    return %arg0, %arg1 : i32, i32
  }
}

</mosaic_0001>

<bundles_post_ra>
// kernel: tpu_custom_call.1
= control target key start
LH: loop header
LB: loop body
LE: loop exit
PB: predicated region body
PF: predicated region fallthrough
CT: control target
= control target key end

     0   :  { %10 = vsyncpa [#allocation4], 0  ;;  %s608_s0 = inlined_call_operand.hbm [shape: f32[8,128], index: 0, kind: input, shape index: {}]   ;;  %s609_s1 = inlined_call_operand.hbm [shape: f32[128,128], index: 1, kind: input, shape index: {}]   ;;  %s610_s2 = inlined_call_operand.hbm [shape: f32[8,128], index: 2, kind: input, shape index: {}]   ;;  %s611_s3 = inlined_call_operand.hbm [shape: f32[128,128], index: 3, kind: input, shape index: {}]   ;;  %s612_s4 = inlined_call_operand.vmem [shape: f32[1,128], index: 4, kind: input, shape index: {}]   ;;  %s613_s5 = inlined_call_operand.hbm [shape: f32[8,128], index: 5, kind: output, shape index: {}]  }
   0x1   :  { %11 = vsyncpa [#allocation7], 0 }
   0x2   :  { %12 = vsyncpa [#allocation10], 0 }
   0x3   :  { %13 = vsyncpa [#allocation5], 0  ;;  %s511_s18 = smov [#allocation6]  }
   0x4   :  { %s29_s19 = sshll.u32 %s511_s18, 4  ;;  %s30_s19 = int_to_ptr.vmem [resolvable:$true] %s29_s19 }
   0x5   :  { %s411_s20 = scalar_lea.vmem %s30_s19, 2048  ;;  %p416_p1 = scmp.lt.s32.totalorder %s30_s19, %s30_s19 }
   0x6   :  { %p412_p0 = scmp.ne.s32.totalorder %s30_s19, %s411_s20  ;;  %p417_p2 = scmp.lt.s32.totalorder %s411_s20, %s411_s20 }
   0x8   :  { %p418_p3 = por %p417_p2, %p416_p1 }
   0xa   :  { %p419_p4 = pnand %p418_p3, %p412_p0 }
   0xc   :  { %422 = shalt.err (!%p419_p4)
}
   0xd   :  { %s512_s21 = smov 128   ;;  %s513_s22 = smov 8  }
   0xe   :  { %35 = dma.hbm_to_vmem [thread:$0]  %s609_s1, 2048, %s30_s19, [#allocation7], %s512_s21, %s512_s21, %s513_s22  }
   0xf   :  { %s514_s25 = smov [#allocation3]   ;;  %s515_s27 = smov [#allocation8]  }
  0x10   :  { %s20_s26 = sshll.u32 %s514_s25, 4  ;;  %s42_s28 = sshll.u32 %s515_s27, 4  ;;  %s21_s26 = int_to_ptr.vmem [resolvable:$true] %s20_s26  ;;  %s43_s28 = int_to_ptr.vmem [resolvable:$true] %s42_s28 }
  0x11   :  { %s431_s29 = scalar_lea.vmem %s21_s26, 128  ;;  %p436_p6 = scmp.lt.s32.totalorder %s21_s26, %s21_s26 }
  0x12   :  { %p432_p5 = scmp.ne.s32.totalorder %s21_s26, %s431_s29  ;;  %p437_p7 = scmp.lt.s32.totalorder %s431_s29, %s431_s29 }
  0x14   :  { %p438_p8 = por %p437_p7, %p436_p6 }
  0x16   :  { %p439_p9 = pnand %p438_p8, %p432_p5 }
  0x18   :  { %442 = shalt.err (!%p439_p9)
}
  0x19   :  { %23 = dma.hbm_to_vmem [thread:$0]  %s608_s0, 128, %s21_s26, [#allocation4]  }
  0x1a   :  { %s451_s7 = scalar_lea.vmem %s43_s28, 128  ;;  %p456_p11 = scmp.lt.s32.totalorder %s43_s28, %s43_s28 }
  0x1b   :  { %p452_p10 = scmp.ne.s32.totalorder %s43_s28, %s451_s7  ;;  %p457_p12 = scmp.lt.s32.totalorder %s451_s7, %s451_s7 }
  0x1d   :  { %p458_p13 = por %p457_p12, %p456_p11 }
  0x1f   :  { %p459_p0 = pnand %p458_p13, %p452_p10 }
  0x21   :  { %462 = shalt.err (!%p459_p0)
}
  0x22   :  { %45 = dma.hbm_to_vmem [thread:$0]  %s610_s2, 128, %s43_s28, [#allocation7]  }
  0x23   :  { %s516_s9 = smov [#allocation9]  }
  0x24   :  { %s51_s10 = sshll.u32 %s516_s9, 4  ;;  %s52_s10 = int_to_ptr.vmem [resolvable:$true] %s51_s10 }
  0x25   :  { %s471_s11 = scalar_lea.vmem %s52_s10, 2048  ;;  %p476_p2 = scmp.lt.s32.totalorder %s52_s10, %s52_s10 }
  0x26   :  { %p472_p1 = scmp.ne.s32.totalorder %s52_s10, %s471_s11  ;;  %p477_p3 = scmp.lt.s32.totalorder %s471_s11, %s471_s11 }
  0x28   :  { %p478_p4 = por %p477_p3, %p476_p2 }
  0x2a   :  { %p479_p5 = pnand %p478_p4, %p472_p1 }
  0x2c   :  { %482 = shalt.err (!%p479_p5)
}
  0x2d   :  { %57 = dma.hbm_to_vmem [thread:$0]  %s611_s3, 2048, %s52_s10, [#allocation10], %s512_s21, %s512_s21, %s513_s22  }
  0x2e   :  { %503 = dma.done.wait [#allocation4], 128  }
  0x2f   :  { %504 = vsyncadd [#allocation4], 4294967168 }
  0x30   :  { %505 = dma.done.wait [#allocation7], 2176  }
  0x31   :  { %506 = vsyncadd [#allocation7], 4294965120 }
  0x32   :  { %507 = dma.done.wait [#allocation10], 2048  }
  0x33   :  { %508 = vsyncadd [#allocation10], 4294965248  ;;  %v517_v0 = vmov 0.0   ;;  %vm518_vm0 = vmmov 0   ;;  %v88_v1 = vld [vmem:[#allocation6 + $0x78] sm:$0xff]  ;;  %v190_v2 = vld [vmem:[#allocation9 + $0x78] sm:$0xff] }
  0x34   :  { %324 = vmatprep.subr.mxu0 %v517_v0  ;;  %359 = vmatprep.subr.mxu1 %v517_v0  ;;  %v87_v3 = vld [vmem:[#allocation6 + $0x70] sm:$0xff]  ;;  %v189_v4 = vld [vmem:[#allocation9 + $0x70] sm:$0xff]  ;;  %v86_v5 = vld [vmem:[#allocation6 + $0x68] sm:$0xff]  ;;  %s519_s13 = smov [#allocation11]  }
  0x35   :  { %356 = vmatprep.mubr.msk.f32.mxu0 %vm518_vm0, %v517_v0  ;;  %391 = vmatprep.mubr.msk.f32.mxu1 %vm518_vm0, %v517_v0  ;;  %v188_v6 = vld [vmem:[#allocation9 + $0x68] sm:$0xff]  ;;  %v85_v7 = vld [vmem:[#allocation6 + $0x60] sm:$0xff]  ;;  %v187_v8 = vld [vmem:[#allocation9 + $0x60] sm:$0xff]  ;;  %s278_s14 = sshll.u32 %s519_s13, 4  ;;  %s279_s14 = int_to_ptr.vmem [resolvable:$true] %s278_s14 }
  0x36   :  { %325 = vmatpush3.msra.mxu0 %v88_v1  ;;  %360 = vmatpush3.msra.mxu1 %v190_v2  ;;  %v84_v9 = vld [vmem:[#allocation6 + $0x58] sm:$0xff]  ;;  %v186_v10 = vld [vmem:[#allocation9 + $0x58] sm:$0xff]  ;;  %v83_v11 = vld [vmem:[#allocation6 + $0x50] sm:$0xff]  ;;  %s483_s15 = scalar_lea.vmem %s279_s14, 128  ;;  %p488_p7 = scmp.lt.s32.totalorder %s279_s14, %s279_s14 }
  0x37   :  { %326 = vmatprep.subr.mxu0 %v517_v0  ;;  %361 = vmatprep.subr.mxu1 %v517_v0  ;;  %v185_v12 = vld [vmem:[#allocation9 + $0x50] sm:$0xff]  ;;  %v82_v13 = vld [vmem:[#allocation6 + $0x48] sm:$0xff]  ;;  %v184_v14 = vld [vmem:[#allocation9 + $0x48] sm:$0xff]  ;;  %p484_p6 = scmp.ne.s32.totalorder %s279_s14, %s483_s15  ;;  %p489_p8 = scmp.lt.s32.totalorder %s483_s15, %s483_s15 }
  0x38   :  { %327 = vmatpush3.msra.mxu0 %v87_v3  ;;  %362 = vmatpush3.msra.mxu1 %v189_v4  ;;  %v81_v15 = vld [vmem:[#allocation6 + $0x40] sm:$0xff]  ;;  %v183_v16 = vld [vmem:[#allocation9 + $0x40] sm:$0xff]  ;;  %v80_v17 = vld [vmem:[#allocation6 + $0x38] sm:$0xff] }
  0x39   :  { %328 = vmatprep.subr.mxu0 %v517_v0  ;;  %363 = vmatprep.subr.mxu1 %v517_v0  ;;  %v182_v18 = vld [vmem:[#allocation9 + $0x38] sm:$0xff]  ;;  %v79_v19 = vld [vmem:[#allocation6 + $0x30] sm:$0xff]  ;;  %v181_v20 = vld [vmem:[#allocation9 + $0x30] sm:$0xff]  ;;  %p490_p9 = por %p489_p8, %p488_p7 }
  0x3a   :  { %329 = vmatpush3.msra.mxu0 %v86_v5  ;;  %364 = vmatpush3.msra.mxu1 %v188_v6  ;;  %v78_v21 = vld [vmem:[#allocation6 + $0x28] sm:$0xff]  ;;  %v180_v22 = vld [vmem:[#allocation9 + $0x28] sm:$0xff]  ;;  %v77_v23 = vld [vmem:[#allocation6 + $0x20] sm:$0xff] }
  0x3b   :  { %330 = vmatprep.subr.mxu0 %v517_v0  ;;  %365 = vmatprep.subr.mxu1 %v517_v0  ;;  %v179_v24 = vld [vmem:[#allocation9 + $0x20] sm:$0xff]  ;;  %v76_v25 = vld [vmem:[#allocation6 + $0x18] sm:$0xff]  ;;  %v178_v26 = vld [vmem:[#allocation9 + $0x18] sm:$0xff]  ;;  %p491_p10 = pnand %p490_p9, %p484_p6 }
  0x3c   :  { %331 = vmatpush3.msra.mxu0 %v85_v7  ;;  %366 = vmatpush3.msra.mxu1 %v187_v8  ;;  %v75_v27 = vld [vmem:[#allocation6 + $0x10] sm:$0xff]  ;;  %v177_v28 = vld [vmem:[#allocation9 + $0x10] sm:$0xff]  ;;  %v74_v29 = vld [vmem:[#allocation6 + $0x8] sm:$0xff] }
  0x3d   :  { %332 = vmatprep.subr.mxu0 %v517_v0  ;;  %367 = vmatprep.subr.mxu1 %v517_v0  ;;  %v176_v30 = vld [vmem:[#allocation9 + $0x8] sm:$0xff]  ;;  %v73_v31 = vld [vmem:[#allocation6] sm:$0xff]  ;;  %v175_v32 = vld [vmem:[#allocation9] sm:$0xff] }
  0x3e   :  { %333 = vmatpush3.msra.mxu0 %v84_v9  ;;  %368 = vmatpush3.msra.mxu1 %v186_v10  ;;  %v72_v33 = vld [vmem:[#allocation3] sm:$0xff]  ;;  %v174_v34 = vld [vmem:[#allocation8] sm:$0xff] }
  0x3f   :  { %334 = vmatprep.subr.mxu0 %v517_v0  ;;  %369 = vmatprep.subr.mxu1 %v517_v0  ;;  %v289_v37 = vld [vmem:[%s612_s4] ss:$0 sm:$0xff] }
  0x40   :  { %335 = vmatpush3.msra.mxu0 %v83_v11  ;;  %370 = vmatpush3.msra.mxu1 %v185_v12 }
  0x41   :  { %336 = vmatprep.subr.mxu0 %v517_v0  ;;  %371 = vmatprep.subr.mxu1 %v517_v0 }
  0x42   :  { %337 = vmatpush3.msra.mxu0 %v82_v13  ;;  %372 = vmatpush3.msra.mxu1 %v184_v14 }
  0x43   :  { %338 = vmatprep.subr.mxu0 %v517_v0  ;;  %373 = vmatprep.subr.mxu1 %v517_v0 }
  0x44   :  { %339 = vmatpush3.msra.mxu0 %v81_v15  ;;  %374 = vmatpush3.msra.mxu1 %v183_v16 }
  0x45   :  { %340 = vmatprep.subr.mxu0 %v517_v0  ;;  %375 = vmatprep.subr.mxu1 %v517_v0 }
  0x46   :  { %341 = vmatpush3.msra.mxu0 %v80_v17  ;;  %376 = vmatpush3.msra.mxu1 %v182_v18 }
  0x47   :  { %342 = vmatprep.subr.mxu0 %v517_v0  ;;  %377 = vmatprep.subr.mxu1 %v517_v0 }
  0x48   :  { %343 = vmatpush3.msra.mxu0 %v79_v19  ;;  %378 = vmatpush3.msra.mxu1 %v181_v20 }
  0x49   :  { %344 = vmatprep.subr.mxu0 %v517_v0  ;;  %379 = vmatprep.subr.mxu1 %v517_v0 }
  0x4a   :  { %345 = vmatpush3.msra.mxu0 %v78_v21  ;;  %380 = vmatpush3.msra.mxu1 %v180_v22 }
  0x4b   :  { %346 = vmatprep.subr.mxu0 %v517_v0  ;;  %381 = vmatprep.subr.mxu1 %v517_v0 }
  0x4c   :  { %347 = vmatpush3.msra.mxu0 %v77_v23  ;;  %382 = vmatpush3.msra.mxu1 %v179_v24 }
  0x4d   :  { %348 = vmatprep.subr.mxu0 %v517_v0  ;;  %383 = vmatprep.subr.mxu1 %v517_v0 }
  0x4e   :  { %349 = vmatpush3.msra.mxu0 %v76_v25  ;;  %384 = vmatpush3.msra.mxu1 %v178_v26 }
  0x4f   :  { %350 = vmatprep.subr.mxu0 %v517_v0  ;;  %385 = vmatprep.subr.mxu1 %v517_v0 }
  0x50   :  { %351 = vmatpush3.msra.mxu0 %v75_v27  ;;  %386 = vmatpush3.msra.mxu1 %v177_v28 }
  0x51   :  { %352 = vmatprep.subr.mxu0 %v517_v0  ;;  %387 = vmatprep.subr.mxu1 %v517_v0 }
  0x52   :  { %353 = vmatpush3.msra.mxu0 %v74_v29  ;;  %388 = vmatpush3.msra.mxu1 %v176_v30 }
  0x53   :  { %354 = vmatprep.subr.mxu0 %v517_v0  ;;  %389 = vmatprep.subr.mxu1 %v517_v0 }
  0x54   :  { %355 = vmatpush3.msra.mxu0 %v73_v31  ;;  %390 = vmatpush3.msra.mxu1 %v175_v32 }
  0x55   :  { %357 = vmatmul.mubr.f32.vlgmr.msra.gmra.mxu0 %v72_v33  ;;  %392 = vmatmul.mubr.f32.vlgmr.msra.gmra.mxu1 %v174_v34 }
 0x115   :  { %v155_v35 = vpop.f32.mrf.mxu0  ;;  %v257_v36 = vpop.f32.mrf.mxu1 }
 0x116   :  { %v262_v38 = vadd.f32 %v257_v36, %v155_v35 }
 0x117   :  { %v358_v39 = vpop.f32.mrf.mxu0  ;;  %v393_v40 = vpop.f32.mrf.mxu1 }
 0x118   :  { %v270_v41 = vadd.f32 %v289_v37, %v262_v38 }
 0x11a   :  { %271 = vst [vmem:[#allocation11] sm:$0xff] %v270_v41 }
 0x11b   :  { %494 = shalt.err (!%p491_p10)
}
 0x11c   :  { %281 = dma.vmem_to_hbm [thread:$0]  %s279_s14, 128, %s613_s5, [#allocation5]  }
 0x11d   :  { %509 = dma.done.wait [#allocation5], 128  }
 0x11e   :  { %510 = vsyncadd [#allocation5], 4294967168 }
 0x11f   :  { %285 = vsyncpa [#allocation4], 1 }
 0x120   :  { %286 = vsyncpa [#allocation7], 1 }
 0x121   :  { %287 = vsyncpa [#allocation10], 1 }
 0x122   :  { %288 = vsyncpa [#allocation5], 1 }

</bundles_post_ra>
